<compile_context>
chip_gen: v7x
topology: tpu7x:2x2x1
jax: 0.10.0
libtpu: 0.0.40
codegen_flags: <defaults>
</compile_context>

<pallas_src>
import functools

import jax
import jax.numpy as jnp
from jax.experimental import pallas as pl
from jax.experimental.pallas import tpu as pltpu

LANE = 128
SUBLANE = 8
# (MAX_BLOCK_ROWS, 128) f32 block = 1 MiB per buffer (2 MiB double-buffered).
MAX_BLOCK_ROWS = 2048
# Leading "parallel" axis: uses both TensorCores on v7x, harmless on v5e/v6e.
NUM_CORE_SPLITS = 2
# Round block rows to 32 so sublane tiling is valid for f32(8)/bf16(16)/8-bit(32).
ROW_ALIGN = 32


def _cdiv(a, b):
    return -(-a // b)


def _round_up(a, b):
    return _cdiv(a, b) * b


def _make_sum_kernel(rows, block_rows, blocks_per_core, needs_mask, acc_dtype):
    def kernel(x_ref, o_ref):
        c = pl.program_id(0)   # core-split index   ("parallel")
        i = pl.program_id(1)   # reduction step     ("arbitrary")

        @pl.when(i == 0)
        def _():
            o_ref[...] = jnp.zeros_like(o_ref)

        # Widen in-register; the DMA moved the original dtype.
        x = x_ref[...].astype(acc_dtype)

        if needs_mask:
            # Zero rows past the true end of the tensor (partial last block or
            # an entirely idle step on the second core split).  `rows`,
            # `blocks_per_core`, `block_rows` are static Python ints.
            start = (c * blocks_per_core + i) * block_rows
            valid = rows - start
            row_ids = jax.lax.broadcasted_iota(jnp.int32, (block_rows, LANE), 0)
            x = jnp.where(row_ids < valid, x, jnp.zeros((), acc_dtype))

        # Sublane/lane-partial accumulation: pure vector adds in the hot loop;
        # the single cross-lane reduction happens once, outside the kernel.
        o_ref[...] += jnp.sum(
            x.reshape(block_rows // SUBLANE, SUBLANE, LANE), axis=0)

    return kernel


def _pallas_sum(x):
    orig_dtype = x.dtype
    if jnp.issubdtype(orig_dtype, jnp.floating):
        acc_dtype = jnp.float32
        res_dtype = orig_dtype
    else:
        # torch.sum promotes integer/bool inputs; match jnp.sum's default
        # 32-bit accumulation (no int64 without x64).
        acc_dtype = jnp.int32
        res_dtype = jnp.int32
        if orig_dtype == jnp.bool_:
            x = x.astype(jnp.int32)

    n = x.size
    if n == 0:
        return jnp.zeros((), dtype=res_dtype)

    x1d = x.reshape(-1)                       # free for contiguous inputs
    pad = (-n) % LANE
    if pad:
        # Only lane-misaligned sizes pay for this copy (<128 zero elements);
        # zeros do not change the sum.
        x1d = jnp.pad(x1d, (0, pad))
    rows = x1d.size // LANE
    x2d = x1d.reshape(rows, LANE)             # free reshape

    block_rows = min(MAX_BLOCK_ROWS, _round_up(rows, ROW_ALIGN))
    total_blocks = _cdiv(rows, block_rows)
    blocks_per_core = _cdiv(total_blocks, NUM_CORE_SPLITS)
    covered_rows = NUM_CORE_SPLITS * blocks_per_core * block_rows
    needs_mask = covered_rows != rows

    kernel = _make_sum_kernel(rows, block_rows, blocks_per_core, needs_mask,
                              acc_dtype)

    partials = pl.pallas_call(
        kernel,
        out_shape=jax.ShapeDtypeStruct(
            (NUM_CORE_SPLITS * SUBLANE, LANE), acc_dtype),
        grid_spec=pltpu.PrefetchScalarGridSpec(
            num_scalar_prefetch=0,
            grid=(NUM_CORE_SPLITS, blocks_per_core),
            in_specs=[pl.BlockSpec(
                (block_rows, LANE),
                lambda c, i: (c * blocks_per_core + i, 0))],
            out_specs=pl.BlockSpec((SUBLANE, LANE), lambda c, i: (c, 0)),
        ),
        compiler_params=pltpu.CompilerParams(
            dimension_semantics=("parallel", "arbitrary")),
    )(x2d)

    # Tiny final cross-lane reduction (NUM_CORE_SPLITS*8*128 elements).
    return jnp.sum(partials).astype(res_dtype)


# jit caches trace/lowering per (shape, dtype).
pallas_sum = jax.jit(_pallas_sum)


def pt_module_forward(inputs):
    """Equivalent of PtModule.forward: list of full-tensor sums."""
    return [pallas_sum(t) for t in inputs]


if __name__ == "__main__":
    key = jax.random.PRNGKey(0)
    k0, k1, k2, k3 = jax.random.split(key, 4)

    inputs = [
        jax.random.normal(k0, (2, 4, 16, 16), dtype=jnp.float32),
        jax.random.normal(k1, (8, 32), dtype=jnp.float32),
        jax.random.normal(k2, (3, 5, 7), dtype=jnp.float32),
        jax.random.randint(k3, (6, 10), -5, 5, dtype=jnp.int32),
    ]

    results = pt_module_forward(inputs)
    results = [jax.block_until_ready(r) for r in results]

    # Verify against plain-JAX reference.
    for r, x in zip(results, inputs):
        ref = jnp.sum(x)
        if jnp.issubdtype(x.dtype, jnp.floating):
            assert jnp.allclose(r, ref, rtol=1e-5, atol=1e-3), (r, ref)
        else:
            assert int(r) == int(ref), (r, ref)

    print("KERNEL_OK")
</pallas_src>

<mosaic_0001>
module attributes {stable_mosaic.version = 11 : i64} {
  func.func @kernel(%arg0: i32, %arg1: i32, %arg2: memref<32x128xf32, #tpu.memory_space<vmem>>, %arg3: memref<8x128xf32, #tpu.memory_space<vmem>>) attributes {dimension_semantics = [#tpu.dimension_semantics<parallel>, #tpu.dimension_semantics<arbitrary>], iteration_bounds = array<i64: 2, 1>, scalar_prefetch = 0 : i64, scratch_operands = 0 : i64, tpu.core_type = #tpu.core_type<tc>, window_params = [{transform_indices = @transform_0, window_bounds = array<i64: 32, 128>}, {transform_indices = @transform_1, window_bounds = array<i64: 8, 128>}]} {
    %c0_i32 = arith.constant 0 : i32
    %0 = arith.cmpi eq, %arg1, %c0_i32 : i32
    %1 = arith.extui %0 : i1 to i32
    %c0_i32_0 = arith.constant 0 : i32
    %2 = arith.cmpi ne, %1, %c0_i32_0 : i32
    scf.if %2 {
      %cst_7 = arith.constant 0.000000e+00 : f32
      %18 = vector.broadcast %cst_7 : f32 to vector<8x128xf32>
      %c0_8 = arith.constant 0 : index
      %c0_9 = arith.constant 0 : index
      %19 = vector.load %arg3[%c0_8, %c0_9] : memref<8x128xf32, #tpu.memory_space<vmem>>, vector<8x128xf32>
      tpu.vector_store %arg3[%c0_8, %c0_9], %18 {strides = array<i32>} : memref<8x128xf32, #tpu.memory_space<vmem>>, vector<8x128xf32>,
    } else {
    }
    %c0 = arith.constant 0 : index
    %c0_1 = arith.constant 0 : index
    %3 = vector.load %arg2[%c0, %c0_1] : memref<32x128xf32, #tpu.memory_space<vmem>>, vector<32x128xf32>
    %c1_i32 = arith.constant 1 : i32
    %4 = arith.muli %arg0, %c1_i32 : i32
    %5 = arith.addi %4, %arg1 : i32
    %c32_i32 = arith.constant 32 : i32
    %6 = arith.muli %5, %c32_i32 : i32
    %c16_i32 = arith.constant 16 : i32
    %7 = arith.subi %c16_i32, %6 : i32
    %8 = tpu.iota {dimensions = array<i32: 0>} : vector<32x128xi32>
    %9 = vector.broadcast %7 : i32 to vector<32x128xi32>
    %10 = arith.cmpi slt, %8, %9 : vector<32x128xi32>
    %cst = arith.constant 0.000000e+00 : f32
    %11 = vector.broadcast %cst : f32 to vector<32x128xf32>
    %12 = arith.select %10, %3, %11 : vector<32x128xi1>, vector<32x128xf32>
    %c0_2 = arith.constant 0 : index
    %c0_3 = arith.constant 0 : index
    %13 = vector.load %arg3[%c0_2, %c0_3] : memref<8x128xf32, #tpu.memory_space<vmem>>, vector<8x128xf32>
    %14 = vector.shape_cast %12 : vector<32x128xf32> to vector<4x8x128xf32>
    %cst_4 = arith.constant dense<0.000000e+00> : vector<8x128xf32>
    %15 = vector.multi_reduction <add>, %14, %cst_4 [0] : vector<4x8x128xf32> to vector<8x128xf32>
    %16 = arith.addf %13, %15 : vector<8x128xf32>
    %c0_5 = arith.constant 0 : index
    %c0_6 = arith.constant 0 : index
    %17 = vector.load %arg3[%c0_5, %c0_6] : memref<8x128xf32, #tpu.memory_space<vmem>>, vector<8x128xf32>
    tpu.vector_store %arg3[%c0_5, %c0_6], %16 {strides = array<i32>} : memref<8x128xf32, #tpu.memory_space<vmem>>, vector<8x128xf32>,
    return
  }
  func.func @transform_0(%arg0: i32, %arg1: i32) -> (i32, i32) {
    %c1_i32 = arith.constant 1 : i32
    %0 = arith.muli %arg0, %c1_i32 : i32
    %1 = arith.addi %0, %arg1 : i32
    %c0_i32 = arith.constant 0 : i32
    %c0_i32_0 = arith.constant 0 : i32
    return %1, %c0_i32 : i32, i32
  }
  func.func @transform_1(%arg0: i32, %arg1: i32) -> (i32, i32) {
    %c0_i32 = arith.constant 0 : i32
    %c0_i32_0 = arith.constant 0 : i32
    return %arg0, %c0_i32 : i32, i32
  }
}

</mosaic_0001>

<bundles_post_ra>
// kernel: _pallas_sum.1
= control target key start
LH: loop header
LB: loop body
LE: loop exit
PB: predicated region body
PF: predicated region fallthrough
CT: control target
= control target key end

     0   :  { %s309_s6 = smov 0   ;;  %s311_s7 = smov 0   ;;  %s342_s0 = inlined_call_operand.vmem [shape: f32[16,128], index: 0, kind: input, shape index: {}]   ;;  %s343_s1 = inlined_call_operand.vmem [shape: f32[16,128], index: 1, kind: output, shape index: {}]  }
   0x1   :  { %s313_s8 = smov 0  }
   0x2 LB: > { %s23_s9 = sadd.s32 1, %s293_s7  ;;  %p243_p0 = scmp.ge.s32.totalorder %s297_s8, 1  ;;  %s297_s8 = sphi %s313_s8, %s11_s8   ;;  %s293_s7 = sphi %s311_s7, %s345_s7   ;;  %s289_s6 = sphi %s309_s6, %s344_s6  }
   0x3   : > { %p25_p1 = scmp.ge.s32.totalorder %s23_s9, 2  ;;  %p108_p2 = scmp.lt.s32.totalorder %s297_s8, 3 }
   0x5   : > { %s347_s9 = smov (%p25_p1, %s23_s9), 0  ;;  %p109_p3 = pnand %p243_p0, %p108_p2 }
   0x6   : > { %s244_s10 = sshll.u32 (!%p109_p3), %s289_s6, 2  ;;  %v158_v0 = vlaneseq (!%p109_p3)  ;;  %s247_s11 = sshll.u32 (!%p109_p3), %s289_s6, 5 }
   0x7   : > { %112 = sbr.rel (%p109_p3) target bundleno = 26 (0x1a), region = 24  ;;  %p134_p4 = scmp.lt.s32.totalorder (!%p109_p3), %s244_s10, 1 }
   0x8   : > { %p142_p5 = scmp.lt.s32.totalorder (!%p109_p3), %s289_s6, 1  ;;  %v159_v1 = vshrl.u32 (!%p109_p3), %v158_v0, 7  ;;  %s157_s12 = ssub.s32 (!%p109_p3), 16, %s247_s11 }
   0x9   : > { %v163_v5 = vstv (!%p109_p3), %s157_s12 }
   0xa   : > { %v160_v2 = vadd.s32 (!%p109_p3), 8, %v159_v1  ;;  %v161_v3 = vadd.s32 (!%p109_p3), 16, %v159_v1  ;;  %v162_v4 = vadd.s32 (!%p109_p3), 24, %v159_v1  ;;  %vm164_vm0 = vcmp.lt.s32.totalorder (!%p109_p3), %v159_v1, %v163_v5 }
   0xc   : > { %vm165_vm1 = vcmp.lt.s32.totalorder (!%p109_p3), %v160_v2, %v163_v5  ;;  %vm166_vm2 = vcmp.lt.s32.totalorder (!%p109_p3), %v161_v3, %v163_v5  ;;  %vm167_vm3 = vcmp.lt.s32.totalorder (!%p109_p3), %v162_v4, %v163_v5 }
   0xe   : > { %s349_s10 = smov (!%p134_p4, %s244_s10), 1  ;;  %s351_s6 = smov (!%p142_p5, %s289_s6), 1 }
   0xf   : > { %s245_s13 = sshll.u32 %s349_s10, 3  ;;  %s246_s17 = sshll.u32 %s351_s6, 3 }
  0x10   : > { %s137_s16 = scalar_lea.vmem %s342_s0, %s245_s13  ;;  %s145_s20 = scalar_lea.vmem %s343_s1, %s246_s17 }
  0x11   : > { %v151_v6 = vld [vmem:[%s137_s16] sm:$0xff]  ;;  %v152_v7 = vld [vmem:[%s137_s16 + $0x8] sm:$0xff]  ;;  %v153_v8 = vld [vmem:[%s137_s16 + $0x10] sm:$0xff] }
  0x12   : > { %v154_v9 = vld [vmem:[%s137_s16 + $0x18] sm:$0xff]  ;;  %v168_v10 = vsel %vm164_vm0, %v151_v6, 0.0  ;;  %v169_v11 = vsel %vm165_vm1, %v152_v7, 0.0  ;;  %v170_v12 = vsel %vm166_vm2, %v153_v8, 0.0 }
  0x13   : > { %v173_v13 = vadd.f32 %v169_v11, %v168_v10  ;;  %v171_v14 = vsel %vm167_vm3, %v154_v9, 0.0 }
  0x15   : > { %v174_v15 = vadd.f32 %v173_v13, %v170_v12 }
  0x17   : > { %v175_v16 = vadd.f32 %v174_v15, %v171_v14 }
  0x19   : > { %177 = vst [vmem:[%s145_s20] sm:$0xff] %v175_v16 }
  0x1a PF: > { %s11_s8 = sadd.s32 1, %s297_s8   ;;  %s344_s6 = smov %s293_s7 }
  0x1b   : > { %p8_p6 = scmp.ge.s32.totalorder %s11_s8, 4   ;;  %s345_s7 = smov %s347_s9 }
  0x1d   :  { %10 = sbr.rel (!%p8_p6) target bundleno = 2 (0x2), region = 58 }

</bundles_post_ra>
